<compile_context>
chip_gen: v5e
topology: v5e:2x2
jax: 0.10.0
libtpu: 0.0.40
codegen_flags: <defaults>
</compile_context>

<pallas_src>
import numpy as np
import jax
import jax.numpy as jnp
from jax import lax
from jax.experimental import pallas as pl
from jax.experimental.pallas import tpu as pltpu


# ---------------- sincos position embeddings (numpy, matches reference) -----
def get_1d_sincos_pos_embed_from_grid(embed_dim, pos):
    if embed_dim % 2 != 0:
        raise ValueError("embed_dim must be even")
    omega = np.arange(embed_dim // 2, dtype=float)
    omega /= embed_dim / 2.0
    omega = 1.0 / 10000 ** omega
    pos = pos.reshape(-1)
    out = np.einsum("m,d->md", pos, omega)
    return np.concatenate([np.sin(out), np.cos(out)], axis=1)


def get_2d_sincos_pos_embed_from_grid(embed_dim, grid):
    if embed_dim % 2 != 0:
        raise ValueError("embed_dim must be even")
    emb_h = get_1d_sincos_pos_embed_from_grid(embed_dim // 2, grid[0])
    emb_w = get_1d_sincos_pos_embed_from_grid(embed_dim // 2, grid[1])
    return np.concatenate([emb_h, emb_w], axis=1)


def get_2d_sincos_pos_embed(embed_dim, grid_size, add_cls_token=False):
    grid_h = np.arange(grid_size, dtype=np.float32)
    grid_w = np.arange(grid_size, dtype=np.float32)
    grid = np.meshgrid(grid_w, grid_h)
    grid = np.stack(grid, axis=0)
    grid = grid.reshape([2, 1, grid_size, grid_size])
    pos_embed = get_2d_sincos_pos_embed_from_grid(embed_dim, grid)
    if add_cls_token:
        pos_embed = np.concatenate([np.zeros([1, embed_dim]), pos_embed], axis=0)
    return pos_embed


# ---------------- helpers ----------------------------------------------------
def _round_up(x, m):
    return ((x + m - 1) // m) * m


def _vmem_capacity_bytes():
    """Physical VMEM of the local TPU (v5e/v6e: 128 MiB, v7x: 64 MiB)."""
    try:
        return int(pltpu.get_tpu_info().vmem_capacity_bytes)
    except Exception:
        return 64 * 1024 * 1024  # conservative (v7x-sized) fallback


def _pick_tile_m(M, N, align, cap):
    """Largest tile_M that divides M, is a multiple of `align` sublanes, is
    <= cap, and is aligned with the pos-embed period N (divides N or is a
    multiple of N) so the VMEM-resident pos table can be sliced in-kernel.

    Returns (tile_M, pos_aligned)."""
    cap = max(align, min(cap, M))
    best_aligned = best_any = None
    for t in range(align, cap + 1, align):
        if M % t:
            continue
        best_any = t
        if N % t == 0 or t % N == 0:
            best_aligned = t
    if best_aligned is not None:
        return best_aligned, True
    if best_any is not None:
        return best_any, False
    return M, True  # whole-array fallback (M = B*N, so always pos-aligned)


# ---------------- Pallas kernel: M-tiled patch matmul + (bias+pos) add -------
def _make_patch_embed_kernel(tile_m, blocks_per_pos):
    def kernel(x_ref, w_ref, pb_ref, out_ref):
        # x_ref : (tile_m, Kpad)   streamed flattened patches (bf16/f32)
        # w_ref : (Kpad, Hpad)     grid-invariant conv weight, MXU-native layout
        # pb_ref: (pos_rows, Hpad) VMEM-resident f32 sincos pos + bias table
        # out_ref:(tile_m, Hpad)   lane-dense output tile
        acc = jnp.dot(x_ref[...], w_ref[...], preferred_element_type=jnp.float32)
        if blocks_per_pos == 1:
            pb = pb_ref[...]
        else:
            start = (pl.program_id(0) % blocks_per_pos) * tile_m
            pb = pb_ref[pl.ds(pl.multiple_of(start, tile_m), tile_m), :]
        out_ref[...] = (acc + pb).astype(out_ref.dtype)

    return kernel


# ---------------- forward -----------------------------------------------------
def patch_embeddings_forward(pixel_values, weight, bias, pos_embed, patch_size,
                             *, compute_dtype=jnp.bfloat16,
                             keep_padded_hidden=False):
    """pixel_values: (B, C, H, W). weight: (hidden, C, P, P). bias: (hidden,).
    pos_embed: (N, hidden) f32 sincos table.  Returns (B, N, hidden).

    compute_dtype: dtype for patches/weight on the MXU (default bf16);
    accumulation is always f32.  Set to None to keep full f32 operands.
    """
    B, C, H, W = pixel_values.shape
    P = patch_size
    gh, gw = H // P, W // P
    N = gh * gw
    hidden = weight.shape[0]
    K = C * P * P
    M = B * N
    out_dtype = weight.dtype

    Kpad = _round_up(K, 128)      # full-lane loads + clean MXU cadence
    Hpad = _round_up(hidden, 128)  # lane-dense output stores

    # --- im2col: flatten non-overlapping patches in (C, ph, pw) order (OIHW).
    # TODO(synk): this reshape/transpose is still a standalone XLA copy of the
    # image; fuse it into the input DMA (allow_input_fusion / in-kernel unfold)
    # once validated on all target generations.
    x = pixel_values.reshape(B, C, gh, P, gw, P)
    x = jnp.transpose(x, (0, 2, 4, 1, 3, 5))          # (B, gh, gw, C, P, P)
    patches = x.reshape(M, K)
    if Kpad != K:
        patches = jnp.pad(patches, ((0, 0), (0, Kpad - K)))

    # --- weight: one-time transpose to (K, hidden), zero-pad to (Kpad, Hpad).
    w2d = jnp.transpose(weight.reshape(hidden, K))    # (K, hidden)
    if Kpad != K or Hpad != hidden:
        w2d = jnp.pad(w2d, ((0, Kpad - K), (0, Hpad - hidden)))

    # --- conv bias folded into the f32 sincos table, hidden padded lane-dense.
    posb = pos_embed.astype(jnp.float32) + bias[None, :].astype(jnp.float32)
    if Hpad != hidden:
        posb = jnp.pad(posb, ((0, 0), (0, Hpad - hidden)))

    if compute_dtype is not None:
        patches = patches.astype(compute_dtype)
        w2d = w2d.astype(compute_dtype)

    x_item = patches.dtype.itemsize
    w_item = w2d.dtype.itemsize
    o_item = np.dtype(out_dtype).itemsize

    # --- generation-aware VMEM budget (v5e/v6e: 128 MiB, v7x: 64 MiB).
    vmem_cap = _vmem_capacity_bytes()
    vmem_limit = int(min(vmem_cap * 3 // 4, 100 * 1024 * 1024))
    budget = int(vmem_limit * 0.8)

    # Min sublane tile: 8 for f32, 16 for bf16 patches.
    sub = 16 if x_item < 4 else 8
    per_row = 2 * (Kpad * x_item + Hpad * o_item + Hpad * 4)
    const_b = 2 * (Kpad * Hpad * w_item + N * Hpad * 4)
    cap = max(sub, min(1024, (budget - const_b) // max(per_row, 1)))
    if M >= 2 * sub:
        cap = min(cap, M // 2)   # >= 2 grid steps so both v7x TensorCores work

    tile_M, pos_aligned = _pick_tile_m(M, N, sub, cap)

    if pos_aligned:
        # Pos+bias table stays fully VMEM-resident (block index never changes);
        # each grid step slices its tile_M rows in-kernel.
        reps = max(1, tile_M // N)
        pos_src = jnp.tile(posb, (reps, 1)) if reps > 1 else posb
        pos_rows = pos_src.shape[0]                    # = max(N, tile_M)
        blocks_per_pos = pos_rows // tile_M            # >= 1
        pos_spec = pl.BlockSpec((pos_rows, Hpad), lambda i: (0, 0))
    else:
        # TODO(synk): slow fallback when no sublane-aligned tile matches the pos
        # period N; duplicates the small pos table across the batch and streams it.
        pos_src = jnp.tile(posb, (M // N, 1))
        blocks_per_pos = 1
        pos_spec = pl.BlockSpec((tile_M, Hpad), lambda i: (i, 0))

    kernel = _make_patch_embed_kernel(tile_M, blocks_per_pos)

    cost = pl.CostEstimate(
        flops=2 * M * Kpad * Hpad,
        transcendentals=0,
        bytes_accessed=(M * Kpad * x_item + Kpad * Hpad * w_item
                        + int(pos_src.shape[0]) * Hpad * 4 + M * Hpad * o_item))

    out = pl.pallas_call(
        kernel,
        out_shape=jax.ShapeDtypeStruct((M, Hpad), out_dtype),
        grid_spec=pltpu.PrefetchScalarGridSpec(
            num_scalar_prefetch=0,
            grid=(M // tile_M,),
            in_specs=[
                pl.BlockSpec((tile_M, Kpad), lambda i: (i, 0)),  # streamed patches
                pl.BlockSpec((Kpad, Hpad), lambda i: (0, 0)),    # grid-invariant weight
                pos_spec,                                        # resident pos+bias
            ],
            out_specs=pl.BlockSpec((tile_M, Hpad), lambda i: (i, 0)),
        ),
        compiler_params=pltpu.CompilerParams(
            dimension_semantics=("parallel",),
            vmem_limit_bytes=vmem_limit),
        cost_estimate=cost,
    )(patches, w2d, pos_src)

    out = out.reshape(B, N, Hpad)
    if Hpad != hidden and not keep_padded_hidden:
        # Keep the padded lane-dense width downstream when possible; unpad here
        # only to match the module's exact output shape.
        out = out[:, :, :hidden]
    # dropout(p=0.0) is the identity -> nothing to do.
    # TODO(synk): interpolate_pos_encoding bicubic path (non-square / resized
    # inputs) is host-side preprocessing and is not implemented here.
    return out


# ---------------- self-test ---------------------------------------------------
def _run_case(batch, num_channels, image_size, patch_size, hidden_size, seed):
    grid_size = image_size // patch_size
    num_patches = grid_size * grid_size

    key = jax.random.PRNGKey(seed)
    kx, kw, kb = jax.random.split(key, 3)

    pixel_values = jax.random.normal(
        kx, (batch, num_channels, image_size, image_size), dtype=jnp.float32)
    weight = jax.random.normal(
        kw, (hidden_size, num_channels, patch_size, patch_size),
        dtype=jnp.float32) * 0.02
    bias = jax.random.normal(kb, (hidden_size,), dtype=jnp.float32) * 0.01
    pos_embed = jnp.asarray(
        get_2d_sincos_pos_embed(hidden_size, grid_size), dtype=jnp.float32)

    out = patch_embeddings_forward(
        pixel_values, weight, bias, pos_embed, patch_size)
    out = jax.block_until_ready(out)
    assert out.shape == (batch, num_patches, hidden_size)

    # Pure-JAX reference: Conv2d(stride=patch) + flatten(2).transpose(1,2) + pos.
    conv = lax.conv_general_dilated(
        pixel_values, weight, window_strides=(patch_size, patch_size),
        padding="VALID", dimension_numbers=("NCHW", "OIHW", "NCHW"))
    ref = conv.reshape(batch, hidden_size, num_patches).transpose(0, 2, 1)
    ref = ref + bias[None, None, :] + pos_embed[None]
    np.testing.assert_allclose(np.asarray(out), np.asarray(ref),
                               rtol=2e-2, atol=2e-2)


if __name__ == "__main__":
    # Case 1: small config consistent with the module's forward
    # (exercises K padding 64->128, hidden padding 32->128, 2 grid steps).
    _run_case(batch=2, num_channels=4, image_size=16, patch_size=4,
              hidden_size=32, seed=0)
    # Case 2: single image with tile_M < N
    # (exercises the in-kernel pl.ds slice of the resident pos table).
    _run_case(batch=1, num_channels=3, image_size=32, patch_size=4,
              hidden_size=48, seed=1)
    print("KERNEL_OK")
</pallas_src>

<mosaic_0001>
module attributes {stable_mosaic.version = 11 : i64} {
  func.func @kernel(%arg0: i32, %arg1: memref<16x128xbf16, #tpu.memory_space<vmem>>, %arg2: memref<128x128xbf16, #tpu.memory_space<vmem>>, %arg3: memref<16x128xf32, #tpu.memory_space<vmem>>, %arg4: memref<16x128xf32, #tpu.memory_space<vmem>>) attributes {dimension_semantics = [#tpu.dimension_semantics<parallel>], iteration_bounds = array<i64: 2>, scalar_prefetch = 0 : i64, scratch_operands = 0 : i64, tpu.core_type = #tpu.core_type<tc>, window_params = [{transform_indices = @transform_0, window_bounds = array<i64: 16, 128>}, {pipeline_mode = #tpu.pipeline_mode<synchronous>, transform_indices = @transform_1, window_bounds = array<i64: 128, 128>}, {pipeline_mode = #tpu.pipeline_mode<synchronous>, transform_indices = @transform_2, window_bounds = array<i64: 16, 128>}, {transform_indices = @transform_3, window_bounds = array<i64: 16, 128>}]} {
    %c0 = arith.constant 0 : index
    %c0_0 = arith.constant 0 : index
    %0 = vector.load %arg1[%c0, %c0_0] : memref<16x128xbf16, #tpu.memory_space<vmem>>, vector<16x128xbf16>
    %c0_1 = arith.constant 0 : index
    %c0_2 = arith.constant 0 : index
    %1 = vector.load %arg2[%c0_1, %c0_2] : memref<128x128xbf16, #tpu.memory_space<vmem>>, vector<128x128xbf16>
    %cst = arith.constant dense<0.000000e+00> : vector<16x128xf32>
    %2 = tpu.matmul %0, %1, %cst {dimension_numbers = #tpu.dot_dimension_numbers<[1], [0], [0], [1], [0, 0, 1, 1], [], []>} : vector<16x128xbf16>, vector<128x128xbf16>, vector<16x128xf32> -> vector<16x128xf32>
    %c0_3 = arith.constant 0 : index
    %c0_4 = arith.constant 0 : index
    %3 = vector.load %arg3[%c0_3, %c0_4] : memref<16x128xf32, #tpu.memory_space<vmem>>, vector<16x128xf32>
    %4 = arith.addf %2, %3 : vector<16x128xf32>
    %c0_5 = arith.constant 0 : index
    %c0_6 = arith.constant 0 : index
    %5 = vector.load %arg4[%c0_5, %c0_6] : memref<16x128xf32, #tpu.memory_space<vmem>>, vector<16x128xf32>
    tpu.vector_store %arg4[%c0_5, %c0_6], %4 {strides = array<i32>} : memref<16x128xf32, #tpu.memory_space<vmem>>, vector<16x128xf32>,
    return
  }
  func.func @transform_0(%arg0: i32) -> (i32, i32) {
    %c0_i32 = arith.constant 0 : i32
    %c0_i32_0 = arith.constant 0 : i32
    return %arg0, %c0_i32 : i32, i32
  }
  func.func @transform_1(%arg0: i32) -> (i32, i32) {
    %c0_i32 = arith.constant 0 : i32
    %c0_i32_0 = arith.constant 0 : i32
    %c0_i32_1 = arith.constant 0 : i32
    return %c0_i32, %c0_i32_0 : i32, i32
  }
  func.func @transform_2(%arg0: i32) -> (i32, i32) {
    %c0_i32 = arith.constant 0 : i32
    %c0_i32_0 = arith.constant 0 : i32
    %c0_i32_1 = arith.constant 0 : i32
    return %c0_i32, %c0_i32_0 : i32, i32
  }
  func.func @transform_3(%arg0: i32) -> (i32, i32) {
    %c0_i32 = arith.constant 0 : i32
    %c0_i32_0 = arith.constant 0 : i32
    return %arg0, %c0_i32 : i32, i32
  }
}

</mosaic_0001>

<bundles_post_ra>
// kernel: tpu_custom_call.1
= control target key start
LH: loop header
LB: loop body
LE: loop exit
PB: predicated region body
PF: predicated region fallthrough
CT: control target
= control target key end

     0   :  { %8 = vsyncpa [#allocation3], 0  ;;  %s900_s0 = inlined_call_operand.hbm [shape: bf16[32,128], index: 0, kind: input, shape index: {}]   ;;  %s901_s1 = inlined_call_operand.hbm [shape: bf16[128,128], index: 1, kind: input, shape index: {}]   ;;  %s902_s2 = inlined_call_operand.hbm [shape: f32[16,128], index: 2, kind: input, shape index: {}]   ;;  %s903_s3 = inlined_call_operand.hbm [shape: f32[32,128], index: 3, kind: output, shape index: {}]  }
   0x1   :  { %10 = vsyncpa [#allocation3 + $0x1], 0 }
   0x2   :  { %11 = vsyncpa [#allocation6], 0 }
   0x3   :  { %12 = vsyncpa [#allocation4], 0 }
   0x4   :  { %14 = vsyncpa [#allocation4 + $0x1], 0  ;;  %s752_s12 = smov 0   ;;  %s754_s13 = smov 0  }
   0x5   :  { %s756_s14 = smov 0   ;;  %s758_s15 = smov 0  }
   0x6 LB: > { %s773_s16 = sadd.s32 4294967295, %s722_s15   ;;  %s424_s17 = sadd.s32 4294967294, %s722_s15   ;;  %s722_s15 = sphi %s758_s15, %s913_s15   ;;  %s718_s14 = sphi %s756_s14, %s912_s14   ;;  %s714_s13 = sphi %s754_s13, %s911_s13   ;;  %s710_s12 = sphi %s752_s12, %s910_s12  }
   0x7   : > { %p40_p0 = scmp.ne.s32.totalorder %s714_s13, %s710_s12  ;;  %p41_p1 = scmp.eq.s32.totalorder %s773_s16, 0 }
   0x8   : > { %p106_p2 = scmp.eq.s32.totalorder %s773_s16, 1  ;;  %p112_p3 = scmp.eq.s32.totalorder %s424_s17, 1 }
   0x9   : > { %p782_p4 = por %p41_p1, %p40_p0  ;;  %p425_p5 = scmp.ge.s32.totalorder %s722_s15, 1 }
   0xa   : > { %p787_p6 = por %p112_p3, %p40_p0  ;;  %p119_p7 = scmp.lt.s32.totalorder %s722_s15, 3 }
   0xb   : > { %s130_s22 = sshll.u32 %s901_s1, 4  ;;  %s724_s24 = smov [#allocation5]   ;;  %s131_s22 = int_to_ptr.hbm [resolvable:$true] %s130_s22 }
   0xc   : > { %p795_p8 = pnand %p425_p5, %p119_p7  ;;  %s132_s25 = sshll.u32 %s724_s24, 4  ;;  %s133_s25 = int_to_ptr.vmem [resolvable:$true] %s132_s25 }
   0xd   : > { %s144_s28 = sshll.u32 %s902_s2, 4  ;;  %s725_s29 = smov 64   ;;  %s145_s28 = int_to_ptr.hbm [resolvable:$true] %s144_s28 }
   0xe   : > { %p501_p9 = pneg %p795_p8  ;;  %s726_s30 = smov 4  }
   0xf   : > { %s727_s4 = smov [#allocation7]   ;;  %s728_s6 = smov 128  }
  0x10   : > { %p502_p10 = pnand %p501_p9, %p41_p1  ;;  %s146_s5 = sshll.u32 %s727_s4, 4  ;;  %s147_s5 = int_to_ptr.vmem [resolvable:$true] %s146_s5 }
  0x11   : > { %s729_s7 = smov 8   ;;  %s811_s8 = sadd.s32 1, %s722_s15  }
  0x12   : > { %504 = dma.hbm_to_vmem [thread:$0]  (!%p502_p10), %s131_s22, 1024, %s133_s25, [#allocation6], %s725_s29, %s725_s29, %s726_s30  }
  0x13   : > { %507 = dma.hbm_to_vmem [thread:$0]  (!%p502_p10), %s145_s28, 256, %s147_s5, [#allocation6], %s728_s6, %s728_s6, %s729_s7  }
  0x14   : > { %s24_s9 = ssub.s32 %s722_s15, %s811_s8  ;;  %s27_s10 = sadd.s32 1, %s718_s14 }
  0x15   : > { %p25_p12 = scmp.eq.s32.totalorder %s24_s9, 0  ;;  %p34_p13 = scmp.ne.s32.totalorder %s718_s14, %s714_s13 }
  0x16   : > { %p35_p0 = scmp.eq.s32.totalorder %s722_s15, 0  ;;  %p518_p7 = scmp.lt.s32.totalorder %s722_s15, 2 }
  0x17   : > { %s820_s11 = scalar_select %p25_p12, %s718_s14, %s27_s10  }
  0x18   : > { %p36_p3 = por %p35_p0, %p34_p13  ;;  %p824_p5 = por %p106_p2, %p34_p13 }
  0x19   : > { %s160_s20 = sand.u32 1, %s718_s14   ;;  %s478_s22 = sshll.u32 %s722_s15, 3 }
  0x1a   : > { %s429_s21 = sshll.u32 %s160_s20, 3  ;;  %s169_s26 = scalar_lea.hbm %s900_s0, %s478_s22 }
  0x1b   : > { %s164_s27 = scalar_lea.vmem [#allocation2], %s429_s21  ;;  %s170_s4 = sshll.u32 %s169_s26, 4  ;;  %s171_s4 = int_to_ptr.hbm [resolvable:$true] %s170_s4 }
  0x1c   : > { %s172_s28 = sshll.u32 %s164_s27, 4  ;;  %p834_p9 = pnand %p518_p7, %p36_p3  ;;  %s173_s28 = int_to_ptr.vmem [resolvable:$true] %s172_s28 }
  0x1d   : > { %s161_s6 = scalar_lea.sflag [#allocation3], %s160_s20  ;;  %s622_s7 = sshra.s32 %s171_s4, 4  ;;  %s623_s7 = int_to_ptr.hbm [resolvable:$true] %s622_s7 }
  0x1e   : > { %s624_s9 = scalar_lea.hbm %s623_s7, 8  ;;  %p626_p10 = pneg %p834_p9 }
  0x1f   : > { %p625_p2 = scmp.ne.s32.totalorder %s623_s7, %s624_s9  ;;  %s629_s22 = scalar_lea.hbm %s900_s0, 16 }
  0x20   : > { %p630_p0 = scmp.lt.s32.totalorder %s623_s7, %s900_s0  ;;  %p631_p3 = scmp.lt.s32.totalorder %s629_s22, %s624_s9 }
  0x21   : > { %p627_p12 = pnand %p626_p10, %p625_p2 }
  0x22   : > { %p632_p7 = por %p631_p3, %p630_p0 }
  0x23   : > { %p628_p13 = pneg %p627_p12 }
  0x25   : > { %p633_p11 = pnand %p632_p7, %p628_p13 }
  0x27   : > { %636 = shalt.err (!%p633_p11)
}
  0x28   : > { %511 = dma.hbm_to_vmem [thread:$0]  (!%p834_p9), %s171_s4, 128, %s173_s28, %s161_s6, %s725_s29, %s725_s29, %s726_s30  }
  0x29   : > { %184 = sbr.rel (%p795_p8) target bundleno = 221 (0xdd), region = 32  ;;  %s854_s20 = sand.u32 (!%p795_p8), 1, %s714_s13  }
  0x2a   : > { %s433_s26 = sshll.u32 (!%p795_p8), %s854_s20, 3  ;;  %s187_s27 = scalar_lea.sflag (!%p795_p8), [#allocation3], %s854_s20 }
  0x2b   : > { %s190_s7 = scalar_lea.vmem (!%p795_p8), [#allocation2], %s433_s26 }
  0x2e   : > { %697 = dma.done.wait (%p782_p4), %s187_s27, 128  }
  0x2f   : > { %699 = vsyncadd (%p782_p4), %s187_s27, 4294967168 }
  0x30   : > { %701 = dma.done.wait (%p41_p1), [#allocation6], 1280  }
  0x31   : > { %703 = vsyncadd (%p41_p1), [#allocation6], 4294966016  ;;  %v487_v0 = vld [vmem:[#allocation5 + $0x38] sm:$0xff]  ;;  %v486_v1 = vld [vmem:[#allocation5 + $0x30] sm:$0xff]  ;;  %s436_s18 = sshll.u32 %s854_s20, 4  ;;  %s488_s23 = sshll.u32 %s773_s16, 4 }
  0x32   : > { %300 = vmatpush.bf16.msra.mxu0 %v487_v0  ;;  %v485_v2 = vld [vmem:[#allocation5 + $0x28] sm:$0xff]  ;;  %v484_v3 = vld [vmem:[#allocation5 + $0x20] sm:$0xff]  ;;  %v483_v4 = vld [vmem:[#allocation5 + $0x18] sm:$0xff]  ;;  %s328_s28 = scalar_lea.hbm %s903_s3, %s488_s23  ;;  %s223_s4 = scalar_lea.vmem [#allocation8], %s436_s18 }
  0x33   : > { %v482_v5 = vld [vmem:[#allocation5 + $0x10] sm:$0xff]  ;;  %v481_v6 = vld [vmem:[#allocation5 + $0x8] sm:$0xff]  ;;  %v480_v7 = vld [vmem:[#allocation5] sm:$0xff]  ;;  %s329_s5 = sshll.u32 %s223_s4, 4  ;;  %s331_s6 = sshll.u32 %s328_s28, 4  ;;  %s330_s5 = int_to_ptr.vmem [resolvable:$true] %s329_s5  ;;  %s332_s6 = int_to_ptr.hbm [resolvable:$true] %s331_s6 }
  0x34   : > { %v479_v8 = vld [vmem:[%s190_s7] sm:$0xff]  ;;  %v244_v9 = vld [vmem:[#allocation7] sm:$0xff]  ;;  %v245_v12 = vld [vmem:[#allocation7 + $0x8] sm:$0xff]  ;;  %s317_s9 = scalar_lea.sflag [#allocation4], %s854_s20  ;;  %s666_s10 = sshra.s32 %s332_s6, 4  ;;  %s667_s10 = int_to_ptr.hbm [resolvable:$true] %s666_s10 }
  0x35   : > { %s668_s16 = scalar_lea.hbm %s667_s10, 16  ;;  %s672_s24 = scalar_lea.hbm %s903_s3, 32 }
  0x36   : > { %301 = vmatpush.bf16.msra.mxu0 %v486_v1  ;;  %p669_p1 = scmp.ne.s32.totalorder %s667_s10, %s668_s16  ;;  %p673_p11 = scmp.lt.s32.totalorder %s667_s10, %s903_s3 }
  0x37   : > { %p674_p9 = scmp.lt.s32.totalorder %s672_s24, %s668_s16 }
  0x38   : > { %p670_p4 = pnand %p669_p1, %p824_p5 }
  0x39   : > { %p675_p2 = por %p674_p9, %p673_p11 }
  0x3a   : > { %302 = vmatpush.bf16.msra.mxu0 %v485_v2  ;;  %p671_p8 = pneg %p670_p4 }
  0x3c   : > { %p676_p10 = pnand %p675_p2, %p671_p8 }
  0x3e   : > { %303 = vmatpush.bf16.msra.mxu0 %v484_v3 }
  0x42   : > { %304 = vmatpush.bf16.msra.mxu0 %v483_v4 }
  0x46   : > { %305 = vmatpush.bf16.msra.mxu0 %v482_v5 }
  0x4a   : > { %306 = vmatpush.bf16.msra.mxu0 %v481_v6 }
  0x4e   : > { %307 = vmatpush.bf16.msra.mxu0 %v480_v7 }
  0x51   : > { %308 = vmatmul.bf16.vlgmr.msra.gmra.mxu0 %v479_v8 }
  0xce   : > { %v309_v10 = vpop.f32.mrf.mxu0 }
  0xcf   : > { %v310_v11 = vadd.f32 %v309_v10, %v244_v9 }
  0xd1   : > { %314 = vst [vmem:[%s223_s4] sm:$0xff] %v310_v11 }
  0xd6   : > { %v311_v13 = vpop.f32.mrf.mxu0 }
  0xd7   : > { %v312_v14 = vadd.f32 %v311_v13, %v245_v12 }
  0xd9   : > { %315 = vst [vmem:[%s223_s4 + $0x8] sm:$0xff] %v312_v14 }
  0xda   : > { %679 = shalt.err (!%p676_p10)
}
  0xdb   : > { %s730_s20 = smov 128   ;;  %s731_s27 = smov 8  }
  0xdc   : > { %499 = dma.vmem_to_hbm [thread:$0]  (%p824_p5), %s330_s5, 256, %s332_s6, %s317_s9, %s730_s20, %s730_s20, %s731_s27  }
  0xdd PF: > { %s346_s7 = sand.u32 1, %s710_s12   ;;  %p909_p12 = scmp.ge.s32.totalorder %s722_s15, 2 }
  0xde   : > { %s347_s18 = scalar_lea.sflag [#allocation4], %s346_s7 }
  0xdf   : > { %p513_p13 = pnand %p909_p12, %p787_p6 }
  0xe1   : > { %p514_p0 = pneg %p513_p13 }
  0xe3   : > { %705 = dma.done.wait (%p514_p0), %s347_s18, 256  }
  0xe4   : > { %707 = vsyncadd (%p514_p0), %s347_s18, 4294967040  ;;  %p17_p3 = scmp.ge.s32.totalorder %s811_s8, 4   ;;  %s910_s12 = smov %s714_s13 }
  0xe5   : > { %s911_s13 = smov %s718_s14  ;;  %s912_s14 = smov %s820_s11 }
  0xe6   : > { %s913_s15 = smov %s811_s8  ;;  %19 = sbr.rel (!%p17_p3) target bundleno = 6 (0x6), region = 85 }
  0xeb   :  { %353 = vsyncpa [#allocation3], 1 }
  0xec   :  { %355 = vsyncpa [#allocation3 + $0x1], 1 }
  0xed   :  { %356 = vsyncpa [#allocation6], 1 }
  0xee   :  { %357 = vsyncpa [#allocation4], 1 }
  0xef   :  { %359 = vsyncpa [#allocation4 + $0x1], 1 }

</bundles_post_ra>
